<compile_context>
chip_gen: v5e
topology: v5e:2x2
jax: 0.10.0
libtpu: 0.0.40
codegen_flags: <defaults>
</compile_context>

<pallas_src>
import jax
import jax.numpy as jnp
from jax import lax
from jax.experimental import pallas as pl
from jax.experimental.pallas import tpu as pltpu

VOCAB_SIZE = 10000
EMBED_DIM = 100
NUM_CLASSES = 10

C_PAD = 128    # class dim padded to a full lane width (lane-dense DMAs/stores)
MAX_TN = 1024  # max tokens per grid block (VMEM use ~2 * tn * 512 B: tiny)


def _text_classifier_kernel(ids_ref, tbl_hbm, out_ref, sem):
    """Pure row gather: out_ref[t, :] = tbl_hbm[ids[base + t], :].

    ids_ref : SMEM (N_pad,)     int32 token ids (scalar prefetch, full array)
    tbl_hbm : HBM  (V, C_PAD)   fused logit table (stays in HBM, no auto-DMA)
    out_ref : VMEM (TN, C_PAD)  logits for this token block (pipelined output)
    sem     : DMA semaphore shared by all row-gather copies of this block
    """
    tn = out_ref.shape[0]
    base = pl.program_id(0) * tn

    # Issue all row-gather DMAs straight into the output block.  All SMEM id
    # reads happen here, before any .wait() (keeps sst->sld forwarding), and
    # the loop is unrolled so descriptor issue is visible to the scheduler.
    def _issue(t, carry):
        tok = ids_ref[base + t]
        pltpu.make_async_copy(
            tbl_hbm.at[pl.ds(tok, 1), :],
            out_ref.at[pl.ds(t, 1), :],
            sem,
        ).start()
        return carry

    lax.fori_loop(0, tn, _issue, 0, unroll=8)

    # Single wait whose descriptor covers the whole block: its byte count
    # equals the sum of the tn single-row copies signalled on `sem`.
    pltpu.make_async_copy(
        tbl_hbm.at[pl.ds(0, tn), :],
        out_ref,
        sem,
    ).wait()


def prepare_params(emb_table, fc_w, fc_b, table_dtype=jnp.float32):
    """One-time prep: fold the Linear into the embedding table.

    logits(x) = emb[x] @ W.T + b  ==  table[x]  with  table = emb @ W.T + b.
    The class dim is zero-padded from C=num_classes to C_PAD=128 lanes.
    (table_dtype=jnp.bfloat16 halves gather/writeback bytes on v6e/v7x at the
    cost of ~1e-3 relative error.)
    """
    emb_f = emb_table.astype(jnp.float32)
    w_f = fc_w.astype(jnp.float32)
    b_f = fc_b.astype(jnp.float32)
    tbl = jnp.dot(emb_f, w_f.T, precision=jax.lax.Precision.HIGHEST) + b_f
    V, C = tbl.shape
    tbl_p = (
        jnp.zeros((V, C_PAD), table_dtype)
        .at[:, :C].set(tbl.astype(table_dtype))
    )
    return tbl_p


def text_classifier_forward(x, logit_table, num_classes=NUM_CLASSES):
    """Pallas equivalent of TextClassifier.forward.

    x:           (B, S) int32 token ids
    logit_table: (V, 128) fused, padded logit table (from prepare_params)
    returns      (B, S, num_classes) f32
    """
    B, S = x.shape
    N = B * S
    V = logit_table.shape[0]

    # Block size: multiple of 8 sublanes, capped at MAX_TN, and sized so there
    # are >= 2 blocks (lets the "parallel" token axis use both v7x TCs).
    half = (N + 1) // 2
    tn = min(MAX_TN, max(8, ((half + 7) // 8) * 8))
    n_blocks = (N + tn - 1) // tn
    n_pad = n_blocks * tn

    # TODO(synk): for N in the 1e5+ range, move ids to a per-block SMEM
    # BlockSpec (or bound N per call) instead of scalar-prefetching the whole
    # array, and dedupe repeated token ids in the wrapper to cut gather DMAs.
    ids = jnp.clip(x.reshape(-1).astype(jnp.int32), 0, V - 1)
    ids = jnp.pad(ids, (0, n_pad - N))  # padded tokens gather row 0 (sliced off)

    out_flat = pl.pallas_call(
        _text_classifier_kernel,
        out_shape=jax.ShapeDtypeStruct((n_pad, C_PAD), logit_table.dtype),
        grid_spec=pltpu.PrefetchScalarGridSpec(
            num_scalar_prefetch=1,
            grid=(n_blocks,),
            in_specs=[
                # Fused logit table stays in HBM; rows are gathered manually.
                pl.BlockSpec(memory_space=pl.ANY),
            ],
            out_specs=pl.BlockSpec((tn, C_PAD), lambda i, ids: (i, 0)),
            scratch_shapes=[pltpu.SemaphoreType.DMA],
        ),
        compiler_params=pltpu.CompilerParams(
            dimension_semantics=("parallel",),
        ),
    )(ids, logit_table)

    out = out_flat[:N, :num_classes].astype(jnp.float32)
    return out.reshape(B, S, num_classes)


def init_params(key):
    """Deterministic synthetic params matching the torch module's shapes."""
    k_emb, k_w, k_b = jax.random.split(key, 3)
    # nn.Embedding default init: N(0, 1)
    emb = jax.random.normal(k_emb, (VOCAB_SIZE, EMBED_DIM), dtype=jnp.float32)
    # nn.Linear default init: U(-1/sqrt(fan_in), 1/sqrt(fan_in))
    bound = 1.0 / (EMBED_DIM ** 0.5)
    fc_w = jax.random.uniform(
        k_w, (NUM_CLASSES, EMBED_DIM), dtype=jnp.float32,
        minval=-bound, maxval=bound)
    fc_b = jax.random.uniform(
        k_b, (NUM_CLASSES,), dtype=jnp.float32, minval=-bound, maxval=bound)
    return emb, fc_w, fc_b


if __name__ == "__main__":
    key = jax.random.PRNGKey(0)
    k_params, k_x = jax.random.split(key)
    emb, fc_w, fc_b = init_params(k_params)

    # One-time parameter prep (fold Linear into the table, pad to 128 lanes).
    logit_table = prepare_params(emb, fc_w, fc_b)
    logit_table = jax.block_until_ready(logit_table)

    B, S = 2, 8  # small batch of token-id sequences
    x = jax.random.randint(k_x, (B, S), 0, VOCAB_SIZE, dtype=jnp.int32)

    out = text_classifier_forward(x, logit_table)
    out = jax.block_until_ready(out)

    # Reference in plain JAX (same math as torch: gather + x @ W.T + b), using
    # HIGHEST precision to match the table precompute.
    gathered = jnp.take(emb, x.reshape(-1), axis=0)
    ref = (
        jnp.dot(gathered, fc_w.T, precision=jax.lax.Precision.HIGHEST) + fc_b
    ).reshape(B, S, NUM_CLASSES)

    assert out.shape == (B, S, NUM_CLASSES), out.shape
    assert out.dtype == jnp.float32
    assert jnp.allclose(out, ref, atol=1e-4, rtol=1e-4), "mismatch vs reference"

    print("KERNEL_OK")
</pallas_src>

<mosaic_0001>
module attributes {stable_mosaic.version = 11 : i64} {
  func.func @_text_classifier_kernel(%arg0: i32, %arg1: memref<16xi32, #tpu.memory_space<smem>>, %arg2: memref<10000x128xf32, #tpu.memory_space<any>>, %arg3: memref<8x128xf32, #tpu.memory_space<vmem>>, %arg4: memref<!tpu.dma_semaphore, #tpu.memory_space<semaphore_mem>>) attributes {dimension_semantics = [#tpu.dimension_semantics<parallel>], iteration_bounds = array<i64: 2>, scalar_prefetch = 1 : i64, scratch_operands = 1 : i64, tpu.core_type = #tpu.core_type<tc>, window_params = [{}, {transform_indices = @transform_1, window_bounds = array<i64: 8, 128>}]} {
    %c8_i32 = arith.constant 8 : i32
    %0 = arith.muli %arg0, %c8_i32 : i32
    %c0_i32 = arith.constant 0 : i32
    %1 = arith.addi %0, %c0_i32 : i32
    %2 = arith.index_cast %1 : i32 to index
    %3 = memref.load %arg1[%2] : memref<16xi32, #tpu.memory_space<smem>>
    %c0_i32_0 = arith.constant 0 : i32
    %4 = tpu.memref_slice %arg2[%3, %c0_i32_0] : memref<10000x128xf32, #tpu.memory_space<any>> -> memref<1x128xf32, #tpu.memory_space<any>>
    %c0_i32_1 = arith.constant 0 : i32
    %5 = tpu.memref_slice %arg3[%c0_i32, %c0_i32_1] : memref<8x128xf32, #tpu.memory_space<vmem>> -> memref<1x128xf32, #tpu.memory_space<vmem>>
    tpu.enqueue_dma source(%4 : memref<1x128xf32, #tpu.memory_space<any>>) target(%5 : memref<1x128xf32, #tpu.memory_space<vmem>>) target_semaphore(%arg4 : memref<!tpu.dma_semaphore, #tpu.memory_space<semaphore_mem>>)
    %c1_i32 = arith.constant 1 : i32
    %6 = arith.addi %0, %c1_i32 : i32
    %7 = arith.index_cast %6 : i32 to index
    %8 = memref.load %arg1[%7] : memref<16xi32, #tpu.memory_space<smem>>
    %c0_i32_2 = arith.constant 0 : i32
    %9 = tpu.memref_slice %arg2[%8, %c0_i32_2] : memref<10000x128xf32, #tpu.memory_space<any>> -> memref<1x128xf32, #tpu.memory_space<any>>
    %c0_i32_3 = arith.constant 0 : i32
    %10 = tpu.memref_slice %arg3[%c1_i32, %c0_i32_3] : memref<8x128xf32, #tpu.memory_space<vmem>> -> memref<1x128xf32, #tpu.memory_space<vmem>>
    tpu.enqueue_dma source(%9 : memref<1x128xf32, #tpu.memory_space<any>>) target(%10 : memref<1x128xf32, #tpu.memory_space<vmem>>) target_semaphore(%arg4 : memref<!tpu.dma_semaphore, #tpu.memory_space<semaphore_mem>>)
    %c2_i32 = arith.constant 2 : i32
    %11 = arith.addi %0, %c2_i32 : i32
    %12 = arith.index_cast %11 : i32 to index
    %13 = memref.load %arg1[%12] : memref<16xi32, #tpu.memory_space<smem>>
    %c0_i32_4 = arith.constant 0 : i32
    %14 = tpu.memref_slice %arg2[%13, %c0_i32_4] : memref<10000x128xf32, #tpu.memory_space<any>> -> memref<1x128xf32, #tpu.memory_space<any>>
    %c0_i32_5 = arith.constant 0 : i32
    %15 = tpu.memref_slice %arg3[%c2_i32, %c0_i32_5] : memref<8x128xf32, #tpu.memory_space<vmem>> -> memref<1x128xf32, #tpu.memory_space<vmem>>
    tpu.enqueue_dma source(%14 : memref<1x128xf32, #tpu.memory_space<any>>) target(%15 : memref<1x128xf32, #tpu.memory_space<vmem>>) target_semaphore(%arg4 : memref<!tpu.dma_semaphore, #tpu.memory_space<semaphore_mem>>)
    %c3_i32 = arith.constant 3 : i32
    %16 = arith.addi %0, %c3_i32 : i32
    %17 = arith.index_cast %16 : i32 to index
    %18 = memref.load %arg1[%17] : memref<16xi32, #tpu.memory_space<smem>>
    %c0_i32_6 = arith.constant 0 : i32
    %19 = tpu.memref_slice %arg2[%18, %c0_i32_6] : memref<10000x128xf32, #tpu.memory_space<any>> -> memref<1x128xf32, #tpu.memory_space<any>>
    %c0_i32_7 = arith.constant 0 : i32
    %20 = tpu.memref_slice %arg3[%c3_i32, %c0_i32_7] : memref<8x128xf32, #tpu.memory_space<vmem>> -> memref<1x128xf32, #tpu.memory_space<vmem>>
    tpu.enqueue_dma source(%19 : memref<1x128xf32, #tpu.memory_space<any>>) target(%20 : memref<1x128xf32, #tpu.memory_space<vmem>>) target_semaphore(%arg4 : memref<!tpu.dma_semaphore, #tpu.memory_space<semaphore_mem>>)
    %c4_i32 = arith.constant 4 : i32
    %21 = arith.addi %0, %c4_i32 : i32
    %22 = arith.index_cast %21 : i32 to index
    %23 = memref.load %arg1[%22] : memref<16xi32, #tpu.memory_space<smem>>
    %c0_i32_8 = arith.constant 0 : i32
    %24 = tpu.memref_slice %arg2[%23, %c0_i32_8] : memref<10000x128xf32, #tpu.memory_space<any>> -> memref<1x128xf32, #tpu.memory_space<any>>
    %c0_i32_9 = arith.constant 0 : i32
    %25 = tpu.memref_slice %arg3[%c4_i32, %c0_i32_9] : memref<8x128xf32, #tpu.memory_space<vmem>> -> memref<1x128xf32, #tpu.memory_space<vmem>>
    tpu.enqueue_dma source(%24 : memref<1x128xf32, #tpu.memory_space<any>>) target(%25 : memref<1x128xf32, #tpu.memory_space<vmem>>) target_semaphore(%arg4 : memref<!tpu.dma_semaphore, #tpu.memory_space<semaphore_mem>>)
    %c5_i32 = arith.constant 5 : i32
    %26 = arith.addi %0, %c5_i32 : i32
    %27 = arith.index_cast %26 : i32 to index
    %28 = memref.load %arg1[%27] : memref<16xi32, #tpu.memory_space<smem>>
    %c0_i32_10 = arith.constant 0 : i32
    %29 = tpu.memref_slice %arg2[%28, %c0_i32_10] : memref<10000x128xf32, #tpu.memory_space<any>> -> memref<1x128xf32, #tpu.memory_space<any>>
    %c0_i32_11 = arith.constant 0 : i32
    %30 = tpu.memref_slice %arg3[%c5_i32, %c0_i32_11] : memref<8x128xf32, #tpu.memory_space<vmem>> -> memref<1x128xf32, #tpu.memory_space<vmem>>
    tpu.enqueue_dma source(%29 : memref<1x128xf32, #tpu.memory_space<any>>) target(%30 : memref<1x128xf32, #tpu.memory_space<vmem>>) target_semaphore(%arg4 : memref<!tpu.dma_semaphore, #tpu.memory_space<semaphore_mem>>)
    %c6_i32 = arith.constant 6 : i32
    %31 = arith.addi %0, %c6_i32 : i32
    %32 = arith.index_cast %31 : i32 to index
    %33 = memref.load %arg1[%32] : memref<16xi32, #tpu.memory_space<smem>>
    %c0_i32_12 = arith.constant 0 : i32
    %34 = tpu.memref_slice %arg2[%33, %c0_i32_12] : memref<10000x128xf32, #tpu.memory_space<any>> -> memref<1x128xf32, #tpu.memory_space<any>>
    %c0_i32_13 = arith.constant 0 : i32
    %35 = tpu.memref_slice %arg3[%c6_i32, %c0_i32_13] : memref<8x128xf32, #tpu.memory_space<vmem>> -> memref<1x128xf32, #tpu.memory_space<vmem>>
    tpu.enqueue_dma source(%34 : memref<1x128xf32, #tpu.memory_space<any>>) target(%35 : memref<1x128xf32, #tpu.memory_space<vmem>>) target_semaphore(%arg4 : memref<!tpu.dma_semaphore, #tpu.memory_space<semaphore_mem>>)
    %c7_i32 = arith.constant 7 : i32
    %36 = arith.addi %0, %c7_i32 : i32
    %37 = arith.index_cast %36 : i32 to index
    %38 = memref.load %arg1[%37] : memref<16xi32, #tpu.memory_space<smem>>
    %c0_i32_14 = arith.constant 0 : i32
    %39 = tpu.memref_slice %arg2[%38, %c0_i32_14] : memref<10000x128xf32, #tpu.memory_space<any>> -> memref<1x128xf32, #tpu.memory_space<any>>
    %c0_i32_15 = arith.constant 0 : i32
    %40 = tpu.memref_slice %arg3[%c7_i32, %c0_i32_15] : memref<8x128xf32, #tpu.memory_space<vmem>> -> memref<1x128xf32, #tpu.memory_space<vmem>>
    tpu.enqueue_dma source(%39 : memref<1x128xf32, #tpu.memory_space<any>>) target(%40 : memref<1x128xf32, #tpu.memory_space<vmem>>) target_semaphore(%arg4 : memref<!tpu.dma_semaphore, #tpu.memory_space<semaphore_mem>>)
    %c8_i32_16 = arith.constant 8 : i32
    %c0_i32_17 = arith.constant 0 : i32
    %c0_i32_18 = arith.constant 0 : i32
    %41 = tpu.memref_slice %arg2[%c0_i32_17, %c0_i32_18] : memref<10000x128xf32, #tpu.memory_space<any>> -> memref<8x128xf32, #tpu.memory_space<any>>
    tpu.wait_dma2 semaphore(%arg4 : memref<!tpu.dma_semaphore, #tpu.memory_space<semaphore_mem>>) src(%41 : memref<8x128xf32, #tpu.memory_space<any>>) dst(%arg3 : memref<8x128xf32, #tpu.memory_space<vmem>>)
    return
  }
  func.func @transform_1(%arg0: i32, %arg1: memref<16xi32, #tpu.memory_space<smem>>) -> (i32, i32) {
    %c0_i32 = arith.constant 0 : i32
    %c0_i32_0 = arith.constant 0 : i32
    return %arg0, %c0_i32 : i32, i32
  }
}

</mosaic_0001>

<bundles_post_ra>
// kernel: tpu_custom_call.1
= control target key start
LH: loop header
LB: loop body
LE: loop exit
PB: predicated region body
PF: predicated region fallthrough
CT: control target
= control target key end

     0   :  { %s639_s12 = smov [#allocation4]   ;;  %s926_s0 = inlined_call_operand.hbm [shape: s32[16], index: 0, kind: input, shape index: {}]   ;;  %s927_s1 = inlined_call_operand.hbm [shape: f32[10000,128], index: 1, kind: input, shape index: {}]   ;;  %s928_s2 = inlined_call_operand.hbm [shape: f32[16,128], index: 2, kind: output, shape index: {}]  }
   0x1   :  { %s8_s11 = sshll.u32 %s926_s0, 4  ;;  %s9_s11 = int_to_ptr.hbm [resolvable:$true] %s8_s11 }
   0x2   :  { %11 = dma.hbm_to_smem %s9_s11, 16, %s639_s12, [#allocation3] }
   0x3   :  { %617 = dma.done.wait [#allocation3], 16 }
   0x4   :  { %618 = vsyncadd [#allocation3], 4294967280 }
   0x5   :  { %14 = sfence }
   0x6   :  { %15 = vsyncpa [#allocation6], 0 }
   0x7   :  { %17 = vsyncpa [#allocation6 + $0x1], 0  ;;  %s658_s13 = smov 0   ;;  %s660_s14 = smov 0  }
   0x8   :  { %s662_s15 = smov 0  }
   0x9 LB: > { %s267_s0 = sadd.s32 4294967295, %s637_s15   ;;  %s675_s16 = sadd.s32 1, %s637_s15   ;;  %s637_s15 = sphi %s662_s15, %s936_s15   ;;  %s633_s14 = sphi %s660_s14, %s935_s14   ;;  %s629_s13 = sphi %s658_s13, %s934_s13  }
   0xa   : > { %s26_s17 = ssub.s32 %s637_s15, %s675_s16  ;;  %s29_s18 = sadd.s32 1, %s633_s14 }
   0xb   : > { %p27_p0 = scmp.eq.s32.totalorder %s26_s17, 0  ;;  %p268_p1 = scmp.ne.s32.totalorder %s26_s17, 0 }
   0xc   : > { %p33_p2 = scmp.eq.s32.totalorder %s637_s15, 1  ;;  %p38_p3 = scmp.ne.s32.totalorder %s633_s14, %s629_s13 }
   0xd   : > { %s684_s19 = scalar_select %p27_p0, %s633_s14, %s29_s18  }
   0xe   : > { %p686_p4 = por %p268_p1, %p33_p2  ;;  %p39_p5 = scmp.eq.s32.totalorder %s267_s0, 1 }
   0xf   : > { %p312_p6 = scmp.lt.s32.totalorder %s637_s15, 2  ;;  %s929_s22 = sand.u32 1, %s633_s14  }
  0x10   : > { %p691_p7 = por %p39_p5, %p38_p3  ;;  %s270_s23 = sshll.u32 %s929_s22, 3 }
  0x11   : > { %s699_s24 = sshll.u32 %s637_s15, 3  ;;  %s707_s29 = scalar_lea.vmem [#allocation5], %s270_s23 }
  0x12   : > { %s280_s25 = scalar_select %p312_p6, [#allocation4], [#allocation25] }
  0x13   : > { %s281_s26 = scalar_select %p312_p6, %s699_s24, 0 }
  0x14   : > { %s72_s27 = sadd.s32 1, %s699_s24  ;;  %s68_s30 = sshll.u32 %s707_s29, 4  ;;  %s715_s30 = int_to_ptr.vmem [resolvable:$true] %s68_s30 }
  0x15   : > { %s57_s28 = sld [smem:[%s280_s25 + %s281_s26]]  ;;  %s938_s27 = smov (!%p312_p6, %s72_s27), 0 }
  0x16   : > { %s283_s3 = scalar_select %p312_p6, [#allocation4], [#allocation26] }
  0x17   : > { %s75_s4 = scalar_lea.vmem %s707_s29, 1 [#allocation5]  ;;  %s89_s12 = sadd.s32 2, %s699_s24 }
  0x18   : > { %s73_s5 = sld [smem:[%s283_s3 + %s938_s27]]  ;;  %s724_s10 = sshll.u32 %s75_s4, 4  ;;  %s86_s10 = int_to_ptr.vmem [resolvable:$true] %s724_s10 }
  0x19   : > { %s719_s6 = scalar_select %p312_p6, [#allocation4], [#allocation27] }
  0x1a   : > { %s92_s0 = scalar_lea.vmem %s707_s29, 2 [#allocation5]  ;;  %s733_s26 = scalar_lea.hbm %s927_s1, 10000 }
  0x1b   : > { %s58_s9 = scalar_lea.hbm %s927_s1, %s57_s28 }
  0x1c   : > { %s66_s11 = sshll.u32 %s58_s9, 4  ;;  %s67_s11 = int_to_ptr.hbm [resolvable:$true] %s66_s11 }
  0x1d   : > { %s351_s17 = sshra.s32 %s67_s11, 4  ;;  %s352_s17 = int_to_ptr.hbm [resolvable:$true] %s351_s17 }
  0x1e   : > { %s353_s18 = scalar_lea.hbm %s352_s17, 1  ;;  %p358_p11 = scmp.lt.s32.totalorder %s352_s17, %s927_s1 }
  0x1f   : > { %p354_p8 = scmp.ne.s32.totalorder %s352_s17, %s353_s18  ;;  %p359_p12 = scmp.lt.s32.totalorder %s733_s26, %s353_s18 }
  0x21   : > { %p355_p9 = pnand %p354_p8, %p312_p6  ;;  %p360_p13 = por %p359_p12, %p358_p11 }
  0x23   : > { %p356_p10 = pneg %p355_p9 }
  0x25   : > { %p361_p0 = pnand %p360_p13, %p356_p10 }
  0x27   : > { %364 = shalt.err (!%p361_p0)  }
  0x28   : > { %282 = dma.hbm_to_vmem [thread:$0]  (%p312_p6), %s67_s11, 16, %s715_s30, [#allocation2] }
  0x29   : > { %s74_s7 = scalar_lea.hbm %s927_s1, %s73_s5  ;;  %s746_s9 = sshll.u32 %s92_s0, 4  ;;  %s103_s9 = int_to_ptr.vmem [resolvable:$true] %s746_s9 }
  0x2a   : > { %s83_s8 = sshll.u32 %s74_s7, 4  ;;  %s106_s17 = sadd.s32 3, %s699_s24  ;;  %s84_s8 = int_to_ptr.hbm [resolvable:$true] %s83_s8 }
  0x2b   : > { %s379_s18 = sshra.s32 %s84_s8, 4  ;;  %s380_s18 = int_to_ptr.hbm [resolvable:$true] %s379_s18 }
  0x2c   : > { %s381_s23 = scalar_lea.hbm %s380_s18, 1  ;;  %p386_p5 = scmp.lt.s32.totalorder %s380_s18, %s927_s1 }
  0x2d   : > { %p382_p1 = scmp.ne.s32.totalorder %s380_s18, %s381_s23  ;;  %p387_p8 = scmp.lt.s32.totalorder %s733_s26, %s381_s23 }
  0x2f   : > { %p383_p2 = pnand %p382_p1, %p312_p6  ;;  %p388_p9 = por %p387_p8, %p386_p5 }
  0x31   : > { %p384_p3 = pneg %p383_p2 }
  0x33   : > { %p389_p10 = pnand %p388_p9, %p384_p3 }
  0x35   : > { %392 = shalt.err (!%p389_p10)  }
  0x36   : > { %285 = dma.hbm_to_vmem [thread:$0]  (%p312_p6), %s84_s8, 16, %s86_s10, [#allocation2] }
  0x37   : > { %s940_s12 = smov (!%p312_p6, %s89_s12), 0  ;;  %s942_s17 = smov (!%p312_p6, %s106_s17), 0 }
  0x38   : > { %s289_s5 = scalar_select %p312_p6, [#allocation4], [#allocation28] }
  0x39   : > { %s90_s11 = sld [smem:[%s719_s6 + %s940_s12]]  ;;  %s109_s0 = scalar_lea.vmem %s707_s29, 3 [#allocation5] }
  0x3a   : > { %s123_s28 = sadd.s32 4, %s699_s24  ;;  %s107_s3 = sld [smem:[%s289_s5 + %s942_s17]] }
  0x3b   : > { %s126_s4 = scalar_lea.vmem %s707_s29, 4 [#allocation5]  ;;  %s944_s28 = smov (!%p312_p6, %s123_s28), 0 }
  0x3c   : > { %s292_s7 = scalar_select %p312_p6, [#allocation4], [#allocation29] }
  0x3d   : > { %s777_s23 = sshll.u32 %s109_s0, 4  ;;  %s781_s25 = sshll.u32 %s126_s4, 4  ;;  %s120_s23 = int_to_ptr.vmem [resolvable:$true] %s777_s23  ;;  %s137_s25 = int_to_ptr.vmem [resolvable:$true] %s781_s25 }
  0x3e   : > { %s779_s12 = sld [smem:[%s292_s7 + %s944_s28]] }
  0x3f   : > { %s91_s18 = scalar_lea.hbm %s927_s1, %s90_s11 }
  0x40   : > { %s100_s6 = sshll.u32 %s91_s18, 4  ;;  %s101_s6 = int_to_ptr.hbm [resolvable:$true] %s100_s6 }
  0x41   : > { %s407_s27 = sshra.s32 %s101_s6, 4  ;;  %s408_s27 = int_to_ptr.hbm [resolvable:$true] %s407_s27 }
  0x42   : > { %s409_s17 = scalar_lea.hbm %s408_s27, 1  ;;  %p414_p0 = scmp.lt.s32.totalorder %s408_s27, %s927_s1 }
  0x43   : > { %p410_p11 = scmp.ne.s32.totalorder %s408_s27, %s409_s17  ;;  %p415_p1 = scmp.lt.s32.totalorder %s733_s26, %s409_s17 }
  0x45   : > { %p411_p12 = pnand %p410_p11, %p312_p6  ;;  %p416_p2 = por %p415_p1, %p414_p0 }
  0x47   : > { %p412_p13 = pneg %p411_p12 }
  0x49   : > { %p417_p3 = pnand %p416_p2, %p412_p13 }
  0x4b   : > { %420 = shalt.err (!%p417_p3)  }
  0x4c   : > { %288 = dma.hbm_to_vmem [thread:$0]  (%p312_p6), %s101_s6, 16, %s103_s9, [#allocation2] }
  0x4d   : > { %s108_s28 = scalar_lea.hbm %s927_s1, %s107_s3  ;;  %s143_s22 = scalar_lea.vmem %s707_s29, 5 [#allocation5] }
  0x4e   : > { %s117_s4 = sshll.u32 %s108_s28, 4  ;;  %s118_s4 = int_to_ptr.hbm [resolvable:$true] %s117_s4 }
  0x4f   : > { %s435_s7 = sshra.s32 %s118_s4, 4  ;;  %s436_s7 = int_to_ptr.hbm [resolvable:$true] %s435_s7 }
  0x50   : > { %s437_s10 = scalar_lea.hbm %s436_s7, 1  ;;  %p442_p10 = scmp.lt.s32.totalorder %s436_s7, %s927_s1 }
  0x51   : > { %p438_p5 = scmp.ne.s32.totalorder %s436_s7, %s437_s10  ;;  %p443_p11 = scmp.lt.s32.totalorder %s733_s26, %s437_s10 }
  0x53   : > { %p439_p8 = pnand %p438_p5, %p312_p6  ;;  %p444_p12 = por %p443_p11, %p442_p10 }
  0x55   : > { %p440_p9 = pneg %p439_p8 }
  0x57   : > { %p445_p13 = pnand %p444_p12, %p440_p9 }
  0x59   : > { %448 = shalt.err (!%p445_p13)  }
  0x5a   : > { %291 = dma.hbm_to_vmem [thread:$0]  (%p312_p6), %s118_s4, 16, %s120_s23, [#allocation2] }
  0x5b   : > { %s125_s6 = scalar_lea.hbm %s927_s1, %s779_s12  ;;  %s140_s27 = sadd.s32 5, %s699_s24 }
  0x5c   : > { %s134_s17 = sshll.u32 %s125_s6, 4  ;;  %s810_s5 = sshll.u32 %s143_s22, 4  ;;  %s135_s17 = int_to_ptr.hbm [resolvable:$true] %s134_s17  ;;  %s154_s5 = int_to_ptr.vmem [resolvable:$true] %s810_s5 }
  0x5d   : > { %s157_s11 = sadd.s32 6, %s699_s24  ;;  %s463_s0 = sshra.s32 %s135_s17, 4  ;;  %s464_s0 = int_to_ptr.hbm [resolvable:$true] %s463_s0 }
  0x5e   : > { %s465_s28 = scalar_lea.hbm %s464_s0, 1  ;;  %p470_p3 = scmp.lt.s32.totalorder %s464_s0, %s927_s1 }
  0x5f   : > { %p466_p0 = scmp.ne.s32.totalorder %s464_s0, %s465_s28  ;;  %p471_p5 = scmp.lt.s32.totalorder %s733_s26, %s465_s28 }
  0x61   : > { %p467_p1 = pnand %p466_p0, %p312_p6  ;;  %p472_p8 = por %p471_p5, %p470_p3 }
  0x63   : > { %p468_p2 = pneg %p467_p1 }
  0x65   : > { %p473_p9 = pnand %p472_p8, %p468_p2 }
  0x67   : > { %476 = shalt.err (!%p473_p9)  }
  0x68   : > { %294 = dma.hbm_to_vmem [thread:$0]  (%p312_p6), %s135_s17, 16, %s137_s25, [#allocation2] }
  0x69   : > { %s295_s23 = scalar_select %p312_p6, [#allocation4], [#allocation30] }
  0x6a   : > { %s946_s27 = smov (!%p312_p6, %s140_s27), 0  ;;  %s948_s11 = smov (!%p312_p6, %s157_s11), 0 }
  0x6b   : > { %s298_s12 = scalar_select %p312_p6, [#allocation4], [#allocation31] }
  0x6c   : > { %s141_s4 = sld [smem:[%s295_s23 + %s946_s27]]  ;;  %s174_s22 = sadd.s32 7, %s699_s24 }
  0x6d   : > { %s158_s8 = sld [smem:[%s298_s12 + %s948_s11]]  ;;  %s160_s18 = scalar_lea.vmem %s707_s29, 6 [#allocation5] }
  0x6e   : > { %s301_s9 = scalar_select %p312_p6, [#allocation4], [#allocation32] }
  0x6f   : > { %s950_s22 = smov (!%p312_p6, %s174_s22), 0  ;;  %s841_s17 = sshll.u32 %s160_s18, 4  ;;  %s171_s17 = int_to_ptr.vmem [resolvable:$true] %s841_s17 }
  0x70   : > { %s843_s27 = sld [smem:[%s301_s9 + %s950_s22]]  ;;  %s177_s28 = scalar_lea.vmem %s707_s29, 7 [#allocation5] }
  0x72   : > { %s142_s6 = scalar_lea.hbm %s927_s1, %s141_s4 }
  0x73   : > { %s151_s0 = sshll.u32 %s142_s6, 4  ;;  %s152_s0 = int_to_ptr.hbm [resolvable:$true] %s151_s0 }
  0x74   : > { %s491_s7 = sshra.s32 %s152_s0, 4  ;;  %s492_s7 = int_to_ptr.hbm [resolvable:$true] %s491_s7 }
  0x75   : > { %s493_s11 = scalar_lea.hbm %s492_s7, 1  ;;  %p498_p13 = scmp.lt.s32.totalorder %s492_s7, %s927_s1 }
  0x76   : > { %p494_p10 = scmp.ne.s32.totalorder %s492_s7, %s493_s11  ;;  %p499_p0 = scmp.lt.s32.totalorder %s733_s26, %s493_s11 }
  0x78   : > { %p495_p11 = pnand %p494_p10, %p312_p6  ;;  %p500_p1 = por %p499_p0, %p498_p13 }
  0x7a   : > { %p496_p12 = pneg %p495_p11 }
  0x7c   : > { %p501_p2 = pnand %p500_p1, %p496_p12 }
  0x7e   : > { %504 = shalt.err (!%p501_p2)  }
  0x7f   : > { %297 = dma.hbm_to_vmem [thread:$0]  (%p312_p6), %s152_s0, 16, %s154_s5, [#allocation2] }
  0x80   : > { %s159_s4 = scalar_lea.hbm %s927_s1, %s158_s8  ;;  %s858_s18 = sshll.u32 %s177_s28, 4  ;;  %s188_s18 = int_to_ptr.vmem [resolvable:$true] %s858_s18 }
  0x81   : > { %s168_s22 = sshll.u32 %s159_s4, 4  ;;  %s169_s22 = int_to_ptr.hbm [resolvable:$true] %s168_s22 }
  0x82   : > { %s519_s9 = sshra.s32 %s169_s22, 4  ;;  %s520_s9 = int_to_ptr.hbm [resolvable:$true] %s519_s9 }
  0x83   : > { %s521_s25 = scalar_lea.hbm %s520_s9, 1  ;;  %p526_p9 = scmp.lt.s32.totalorder %s520_s9, %s927_s1 }
  0x84   : > { %p522_p3 = scmp.ne.s32.totalorder %s520_s9, %s521_s25  ;;  %p527_p10 = scmp.lt.s32.totalorder %s733_s26, %s521_s25 }
  0x86   : > { %p523_p5 = pnand %p522_p3, %p312_p6  ;;  %p528_p11 = por %p527_p10, %p526_p9 }
  0x88   : > { %p524_p8 = pneg %p523_p5 }
  0x8a   : > { %p529_p12 = pnand %p528_p11, %p524_p8 }
  0x8c   : > { %532 = shalt.err (!%p529_p12)  }
  0x8d   : > { %300 = dma.hbm_to_vmem [thread:$0]  (%p312_p6), %s169_s22, 16, %s171_s17, [#allocation2] }
  0x8e   : > { %s176_s0 = scalar_lea.hbm %s927_s1, %s843_s27 }
  0x8f   : > { %s185_s28 = sshll.u32 %s176_s0, 4  ;;  %s186_s28 = int_to_ptr.hbm [resolvable:$true] %s185_s28 }
  0x90   : > { %s547_s7 = sshra.s32 %s186_s28, 4  ;;  %s548_s7 = int_to_ptr.hbm [resolvable:$true] %s547_s7 }
  0x91   : > { %s549_s11 = scalar_lea.hbm %s548_s7, 1  ;;  %p554_p2 = scmp.lt.s32.totalorder %s548_s7, %s927_s1 }
  0x92   : > { %p550_p13 = scmp.ne.s32.totalorder %s548_s7, %s549_s11  ;;  %p555_p3 = scmp.lt.s32.totalorder %s733_s26, %s549_s11 }
  0x94   : > { %p551_p0 = pnand %p550_p13, %p312_p6  ;;  %p556_p5 = por %p555_p3, %p554_p2 }
  0x96   : > { %p552_p1 = pneg %p551_p0 }
  0x98   : > { %p557_p8 = pnand %p556_p5, %p552_p1 }
  0x9a   : > { %560 = shalt.err (!%p557_p8)  }
  0x9b   : > { %303 = dma.hbm_to_vmem [thread:$0]  (%p312_p6), %s186_s28, 16, %s188_s18, [#allocation2] }
  0x9c   : > { %620 = dma.done.wait (%p312_p6), [#allocation2], 128 }
  0x9d   : > { %622 = vsyncadd (%p312_p6), [#allocation2], 4294967168  ;;  %s205_s26 = scalar_lea.hbm %s928_s2, %s699_s24  ;;  %p893_p9 = pnand %p312_p6, %p686_p4 }
  0x9e   : > { %s209_s29 = sshll.u32 %s205_s26, 4  ;;  %p313_p10 = scmp.ge.s32.totalorder %s637_s15, 1  ;;  %s210_s29 = int_to_ptr.hbm [resolvable:$true] %s209_s29 }
  0x9f   : > { %s933_s4 = sand.u32 1, %s633_s14   ;;  %p579_p11 = pneg %p893_p9 }
  0xa0   : > { %s195_s22 = scalar_lea.sflag [#allocation6], %s933_s4  ;;  %s590_s18 = sshra.s32 %s210_s29, 4  ;;  %s591_s18 = int_to_ptr.hbm [resolvable:$true] %s590_s18 }
  0xa1   : > { %s592_s9 = scalar_lea.hbm %s591_s18, 8  ;;  %s597_s25 = scalar_lea.hbm %s928_s2, 16 }
  0xa2   : > { %p593_p12 = scmp.ne.s32.totalorder %s591_s18, %s592_s9  ;;  %p598_p4 = scmp.lt.s32.totalorder %s591_s18, %s928_s2 }
  0xa3   : > { %p599_p6 = scmp.lt.s32.totalorder %s597_s25, %s592_s9 }
  0xa4   : > { %p595_p13 = pnand %p593_p12, %p579_p11 }
  0xa5   : > { %p600_p1 = por %p599_p6, %p598_p4 }
  0xa6   : > { %p596_p0 = pneg %p595_p13 }
  0xa8   : > { %p601_p2 = pnand %p600_p1, %p596_p0 }
  0xaa   : > { %604 = shalt.err (!%p601_p2)
}
  0xab   : > { %307 = dma.vmem_to_hbm [thread:$0]  (!%p893_p9), %s715_s30, 128, %s210_s29, %s195_s22  }
  0xac   : > { %s221_s5 = sand.u32 1, %s629_s13   ;;  %p309_p3 = pnand %p313_p10, %p691_p7 }
  0xad   : > { %s222_s8 = scalar_lea.sflag [#allocation6], %s221_s5 }
  0xae   : > { %p310_p5 = pneg %p309_p3 }
  0xb0   : > { %624 = dma.done.wait (%p310_p5), %s222_s8, 128  }
  0xb1   : > { %626 = vsyncadd (%p310_p5), %s222_s8, 4294967168  ;;  %p20_p8 = scmp.ge.s32.totalorder %s675_s16, 3   ;;  %s934_s13 = smov %s633_s14 }
  0xb2   : > { %s935_s14 = smov %s684_s19  ;;  %s936_s15 = smov %s675_s16 }
  0xb3   :  { %22 = sbr.rel (!%p20_p8) target bundleno = 9 (0x9), region = 91 }
  0xb8   :  { %228 = vsyncpa [#allocation6], 1 }
  0xb9   :  { %230 = vsyncpa [#allocation6 + $0x1], 1 }
  0xba   :  { %231 = vsyncmov [#allocation2] }
  0xbd   :  { %s232_s15 = vpop.sfrf %231 }
  0xbe   :  { %p276_p7 = scmp.ne.s32.totalorder %s232_s15, 0 }
  0xc0   :  { %236 = shalt.err (%p276_p7)  }

</bundles_post_ra>
